<compile_context>
chip_gen: v5e
topology: v5e:2x2
jax: 0.10.0
libtpu: 0.0.40
codegen_flags: <defaults>
</compile_context>

<pallas_src>
import functools

import jax
import jax.numpy as jnp
from jax.experimental import pallas as pl
from jax.experimental.pallas import tpu as pltpu


# ----------------------------- kernel helpers ------------------------------ #
def _matmul(w, x):
    """w: [dout, k], x: [k, tn] -> [dout, tn].

    For tiny contraction dims (K <= 8, e.g. the D0=3 prototype features) use
    VPU broadcast multiply-adds; otherwise use the MXU."""
    k = x.shape[0]
    if k <= 8:
        acc = w[:, 0:1] * x[0:1, :]
        for i in range(1, k):
            acc = acc + w[:, i:i + 1] * x[i:i + 1, :]
        return acc
    return jnp.dot(w, x, preferred_element_type=jnp.float32)


# ----------------------------- kernel -------------------------------------- #
def _decoder_kernel(n_pre, n_fold, proto_ref, cbias_ref, *refs):
    """Transposed decoder body: activations are [features, tile_n].

    refs = (pre-MLP (W,b) pairs..., fused fold-0 prototype weight,
            remaining fold (W,b) pairs..., out_ref)
    All weights are stored as [dout, din]; biases as [dout, 1]."""
    out_ref = refs[-1]
    params = refs[:-1]

    h = proto_ref[...]                                   # [D0, tn]
    idx = 0
    # MLP layers before the last one (each followed by ReLU).
    for _ in range(n_pre):
        w = params[idx][...]
        b = params[idx + 1][...]
        idx += 2
        h = jnp.maximum(_matmul(w, h) + b, 0.0)

    # cat((mlp(proto), codeword)) @ W_fold0 + b_fold0, with the ReLU-free last
    # MLP layer fused into wp and the codeword half + all biases precomputed
    # per batch in cbias_ref ([f1, 1], broadcast along lanes).
    wp = params[idx][...]
    idx += 1
    h = _matmul(wp, h) + cbias_ref[...]
    if n_fold > 1:
        h = jnp.maximum(h, 0.0)

    # Remaining fold layers (no ReLU after the very last one).
    for i in range(1, n_fold):
        w = params[idx][...]
        b = params[idx + 1][...]
        idx += 2
        h = _matmul(w, h) + b
        if i < n_fold - 1:
            h = jnp.maximum(h, 0.0)

    out_ref[...] = h.astype(out_ref.dtype)               # [out_dim, tn] lane-dense


# ----------------------------- wrapper -------------------------------------- #
def deepsoro_decoder(global_codeword, prototype, mlp_params, fold_params, tn=1024):
    """global_codeword: [B, C]; prototype: [N, D0].
    mlp_params / fold_params: lists of (W [din, dout], b [dout]) tuples."""
    B, C = global_codeword.shape
    N, D0 = prototype.shape
    n_mlp, n_fold = len(mlp_params), len(fold_params)
    assert n_mlp >= 1 and n_fold >= 1
    mlp_out = mlp_params[-1][0].shape[1]
    out_dim = fold_params[-1][0].shape[1]
    assert fold_params[0][0].shape[0] == mlp_out + C

    # --- fold the (ReLU-free) last MLP layer into fold layer 0's prototype half.
    w_last, b_last = mlp_params[-1]                      # [d_pre, mlp_out], [mlp_out]
    w0, b0 = fold_params[0]                              # [mlp_out+C, f1], [f1]
    wp, wc = w0[:mlp_out], w0[mlp_out:]                  # [mlp_out, f1], [C, f1]
    wp_fused = (w_last @ wp).astype(jnp.float32)         # [d_pre, f1]
    f1 = wp.shape[1]

    # --- per-batch codeword contribution + all fold-0 biases (tiny: [B, f1]).
    code_bias = (global_codeword @ wc + b_last @ wp + b0).astype(jnp.float32)
    code_bias = code_bias.reshape(B, f1, 1)

    # --- lane-dense point tiling (points on the lane axis).
    tn = max(128, (min(tn, N) + 127) // 128 * 128)
    n_pad = (N + tn - 1) // tn * tn
    proto_t = prototype.T.astype(jnp.float32)            # [D0, N]
    if n_pad != N:
        proto_t = jnp.pad(proto_t, ((0, 0), (0, n_pad - N)))

    # --- resident (transposed) weights: [dout, din] / [dout, 1].
    flat_params = []
    for w, b in mlp_params[:-1]:
        flat_params += [w.T.astype(jnp.float32), b.reshape(-1, 1).astype(jnp.float32)]
    flat_params.append(wp_fused.T)                       # [f1, d_pre]
    for w, b in fold_params[1:]:
        flat_params += [w.T.astype(jnp.float32), b.reshape(-1, 1).astype(jnp.float32)]

    resident = lambda a: pl.BlockSpec(a.shape, lambda b_, j: (0, 0))
    grid = (B, n_pad // tn)

    out = pl.pallas_call(
        functools.partial(_decoder_kernel, n_mlp - 1, n_fold),
        out_shape=jax.ShapeDtypeStruct((B, out_dim, n_pad), jnp.float32),
        grid_spec=pltpu.PrefetchScalarGridSpec(
            num_scalar_prefetch=0,
            grid=grid,
            in_specs=[
                # prototype columns: shared across batches, one tile per j
                pl.BlockSpec((D0, tn), lambda b_, j: (0, j)),
                # per-batch fused bias column (codeword half + biases)
                pl.BlockSpec((None, f1, 1), lambda b_, j: (b_, 0, 0)),
            ] + [resident(p) for p in flat_params],
            out_specs=pl.BlockSpec((None, out_dim, tn), lambda b_, j: (b_, 0, j)),
        ),
        compiler_params=pltpu.CompilerParams(
            dimension_semantics=("parallel", "parallel")),
    )(proto_t, code_bias, *flat_params)

    # [B, out_dim, N_pad] -> [B, N, out_dim]
    return jnp.transpose(out[:, :, :N], (0, 2, 1))


# ----------------------------- reference (plain JAX) ------------------------ #
def deepsoro_decoder_ref(global_codeword, prototype, mlp_params, fold_params):
    B, C = global_codeword.shape
    N, D0 = prototype.shape
    h = jnp.broadcast_to(prototype[None], (B, N, D0))
    for i, (w, b) in enumerate(mlp_params):
        h = h @ w + b
        if i < len(mlp_params) - 1:
            h = jnp.maximum(h, 0.0)
    code = jnp.broadcast_to(global_codeword[:, None, :], (B, N, C))
    h = jnp.concatenate([h, code], axis=-1)
    for i, (w, b) in enumerate(fold_params):
        h = h @ w + b
        if i < len(fold_params) - 1:
            h = jnp.maximum(h, 0.0)
    return h


# ----------------------------- param init ----------------------------------- #
def init_mlp(key, dims):
    """Xavier-uniform (gain = sqrt(2), as in nn.init.calculate_gain('relu')),
    zero bias. Weights stored as [din, dout] so the math is x @ W + b."""
    gain = 2.0 ** 0.5
    params = []
    for din, dout in zip(dims[:-1], dims[1:]):
        key, sub = jax.random.split(key)
        bound = gain * (6.0 / (din + dout)) ** 0.5
        w = jax.random.uniform(sub, (din, dout), jnp.float32, -bound, bound)
        b = jnp.zeros((dout,), jnp.float32)
        params.append((w, b))
    return key, params


if __name__ == "__main__":
    B, C = 2, 32          # batch, global codeword dim
    N, D0 = 1024, 3       # prototype: N points with D0 features
    mlp_dims = [D0, 32, 64]
    fold_dims = [mlp_dims[-1] + C, 64, 3]

    key = jax.random.PRNGKey(0)
    key, mlp_params = init_mlp(key, mlp_dims)
    key, fold_params = init_mlp(key, fold_dims)
    key, k1, k2 = jax.random.split(key, 3)
    global_codeword = jax.random.normal(k1, (B, C), jnp.float32)
    prototype = jax.random.normal(k2, (N, D0), jnp.float32)

    out = deepsoro_decoder(global_codeword, prototype, mlp_params, fold_params)
    out = jax.block_until_ready(out)

    ref = deepsoro_decoder_ref(global_codeword, prototype, mlp_params, fold_params)
    assert out.shape == (B, N, fold_dims[-1])
    assert jnp.allclose(out, ref, atol=1e-4, rtol=1e-4), "mismatch vs reference"

    print("KERNEL_OK")
</pallas_src>

<mosaic_0001>
module attributes {stable_mosaic.version = 11 : i64} {
  func.func @_decoder_kernel(%arg0: i32, %arg1: i32, %arg2: memref<3x1024xf32, #tpu.memory_space<vmem>>, %arg3: memref<1x64x1xf32, #tpu.memory_space<vmem>>, %arg4: memref<32x3xf32, #tpu.memory_space<vmem>>, %arg5: memref<32x1xf32, #tpu.memory_space<vmem>>, %arg6: memref<64x32xf32, #tpu.memory_space<vmem>>, %arg7: memref<3x64xf32, #tpu.memory_space<vmem>>, %arg8: memref<3x1xf32, #tpu.memory_space<vmem>>, %arg9: memref<1x3x1024xf32, #tpu.memory_space<vmem>>) attributes {dimension_semantics = [#tpu.dimension_semantics<parallel>, #tpu.dimension_semantics<parallel>], iteration_bounds = array<i64: 2, 1>, scalar_prefetch = 0 : i64, scratch_operands = 0 : i64, tpu.core_type = #tpu.core_type<tc>, window_params = [{transform_indices = @transform_0, window_bounds = array<i64: 3, 1024>}, {transform_indices = @transform_1, window_bounds = array<i64: 1, 64, 1>}, {pipeline_mode = #tpu.pipeline_mode<synchronous>, transform_indices = @transform_2, window_bounds = array<i64: 32, 3>}, {pipeline_mode = #tpu.pipeline_mode<synchronous>, transform_indices = @transform_3, window_bounds = array<i64: 32, 1>}, {pipeline_mode = #tpu.pipeline_mode<synchronous>, transform_indices = @transform_4, window_bounds = array<i64: 64, 32>}, {pipeline_mode = #tpu.pipeline_mode<synchronous>, transform_indices = @transform_5, window_bounds = array<i64: 3, 64>}, {pipeline_mode = #tpu.pipeline_mode<synchronous>, transform_indices = @transform_6, window_bounds = array<i64: 3, 1>}, {transform_indices = @transform_7, window_bounds = array<i64: 1, 3, 1024>}]} {
    %c0 = arith.constant 0 : index
    %c0_0 = arith.constant 0 : index
    %0 = vector.load %arg2[%c0, %c0_0] : memref<3x1024xf32, #tpu.memory_space<vmem>>, vector<3x1024xf32>
    %c0_1 = arith.constant 0 : index
    %c0_2 = arith.constant 0 : index
    %1 = vector.load %arg4[%c0_1, %c0_2] : memref<32x3xf32, #tpu.memory_space<vmem>>, vector<32x3xf32>
    %c0_3 = arith.constant 0 : index
    %c0_4 = arith.constant 0 : index
    %2 = vector.load %arg5[%c0_3, %c0_4] : memref<32x1xf32, #tpu.memory_space<vmem>>, vector<32x1xf32>
    %3 = vector.extract_strided_slice %1 {offsets = [0, 0], sizes = [32, 1], strides = [1, 1]} : vector<32x3xf32> to vector<32x1xf32>
    %4 = vector.extract_strided_slice %0 {offsets = [0, 0], sizes = [1, 1024], strides = [1, 1]} : vector<3x1024xf32> to vector<1x1024xf32>
    %5 = vector.broadcast %3 : vector<32x1xf32> to vector<32x1024xf32>
    %6 = vector.broadcast %4 : vector<1x1024xf32> to vector<32x1024xf32>
    %7 = arith.mulf %5, %6 : vector<32x1024xf32>
    %8 = vector.extract_strided_slice %1 {offsets = [0, 1], sizes = [32, 1], strides = [1, 1]} : vector<32x3xf32> to vector<32x1xf32>
    %9 = vector.extract_strided_slice %0 {offsets = [1, 0], sizes = [1, 1024], strides = [1, 1]} : vector<3x1024xf32> to vector<1x1024xf32>
    %10 = vector.broadcast %8 : vector<32x1xf32> to vector<32x1024xf32>
    %11 = vector.broadcast %9 : vector<1x1024xf32> to vector<32x1024xf32>
    %12 = arith.mulf %10, %11 : vector<32x1024xf32>
    %13 = arith.addf %7, %12 : vector<32x1024xf32>
    %14 = vector.extract_strided_slice %1 {offsets = [0, 2], sizes = [32, 1], strides = [1, 1]} : vector<32x3xf32> to vector<32x1xf32>
    %15 = vector.extract_strided_slice %0 {offsets = [2, 0], sizes = [1, 1024], strides = [1, 1]} : vector<3x1024xf32> to vector<1x1024xf32>
    %16 = vector.broadcast %14 : vector<32x1xf32> to vector<32x1024xf32>
    %17 = vector.broadcast %15 : vector<1x1024xf32> to vector<32x1024xf32>
    %18 = arith.mulf %16, %17 : vector<32x1024xf32>
    %19 = arith.addf %13, %18 : vector<32x1024xf32>
    %20 = vector.broadcast %2 : vector<32x1xf32> to vector<32x1024xf32>
    %21 = arith.addf %19, %20 : vector<32x1024xf32>
    %cst = arith.constant 0.000000e+00 : f32
    %22 = vector.broadcast %cst : f32 to vector<32x1024xf32>
    %23 = arith.maximumf %21, %22 : vector<32x1024xf32>
    %c0_5 = arith.constant 0 : index
    %c0_6 = arith.constant 0 : index
    %24 = vector.load %arg6[%c0_5, %c0_6] : memref<64x32xf32, #tpu.memory_space<vmem>>, vector<64x32xf32>
    %cst_7 = arith.constant dense<0.000000e+00> : vector<64x1024xf32>
    %25 = tpu.matmul %24, %23, %cst_7 {dimension_numbers = #tpu.dot_dimension_numbers<[1], [0], [0], [1], [0, 0, 1, 1], [], []>} : vector<64x32xf32>, vector<32x1024xf32>, vector<64x1024xf32> -> vector<64x1024xf32>
    %c0_8 = arith.constant 0 : index
    %c0_9 = arith.constant 0 : index
    %c0_10 = arith.constant 0 : index
    %26 = vector.load %arg3[%c0_8, %c0_9, %c0_10] : memref<1x64x1xf32, #tpu.memory_space<vmem>>, vector<1x64x1xf32>
    %27 = vector.shape_cast %26 : vector<1x64x1xf32> to vector<64x1xf32>
    %28 = vector.broadcast %27 : vector<64x1xf32> to vector<64x1024xf32>
    %29 = arith.addf %25, %28 : vector<64x1024xf32>
    %cst_11 = arith.constant 0.000000e+00 : f32
    %30 = vector.broadcast %cst_11 : f32 to vector<64x1024xf32>
    %31 = arith.maximumf %29, %30 : vector<64x1024xf32>
    %c0_12 = arith.constant 0 : index
    %c0_13 = arith.constant 0 : index
    %32 = vector.load %arg7[%c0_12, %c0_13] : memref<3x64xf32, #tpu.memory_space<vmem>>, vector<3x64xf32>
    %c0_14 = arith.constant 0 : index
    %c0_15 = arith.constant 0 : index
    %33 = vector.load %arg8[%c0_14, %c0_15] : memref<3x1xf32, #tpu.memory_space<vmem>>, vector<3x1xf32>
    %cst_16 = arith.constant dense<0.000000e+00> : vector<3x1024xf32>
    %34 = tpu.matmul %32, %31, %cst_16 {dimension_numbers = #tpu.dot_dimension_numbers<[1], [0], [0], [1], [0, 0, 1, 1], [], []>} : vector<3x64xf32>, vector<64x1024xf32>, vector<3x1024xf32> -> vector<3x1024xf32>
    %35 = vector.broadcast %33 : vector<3x1xf32> to vector<3x1024xf32>
    %36 = arith.addf %34, %35 : vector<3x1024xf32>
    %c0_17 = arith.constant 0 : index
    %c0_18 = arith.constant 0 : index
    %c0_19 = arith.constant 0 : index
    %37 = vector.load %arg9[%c0_17, %c0_18, %c0_19] : memref<1x3x1024xf32, #tpu.memory_space<vmem>>, vector<1x3x1024xf32>
    %38 = vector.shape_cast %37 : vector<1x3x1024xf32> to vector<3x1024xf32>
    %39 = vector.shape_cast %36 : vector<3x1024xf32> to vector<1x3x1024xf32>
    tpu.vector_store %arg9[%c0_17, %c0_18, %c0_19], %39 {strides = array<i32>} : memref<1x3x1024xf32, #tpu.memory_space<vmem>>, vector<1x3x1024xf32>,
    return
  }
  func.func @transform_0(%arg0: i32, %arg1: i32) -> (i32, i32) {
    %c0_i32 = arith.constant 0 : i32
    %c0_i32_0 = arith.constant 0 : i32
    return %c0_i32, %arg1 : i32, i32
  }
  func.func @transform_1(%arg0: i32, %arg1: i32) -> (i32, i32, i32) {
    %c0_i32 = arith.constant 0 : i32
    %c0_i32_0 = arith.constant 0 : i32
    %c0_i32_1 = arith.constant 0 : i32
    return %arg0, %c0_i32, %c0_i32_0 : i32, i32, i32
  }
  func.func @transform_2(%arg0: i32, %arg1: i32) -> (i32, i32) {
    %c0_i32 = arith.constant 0 : i32
    %c0_i32_0 = arith.constant 0 : i32
    %c0_i32_1 = arith.constant 0 : i32
    return %c0_i32, %c0_i32_0 : i32, i32
  }
  func.func @transform_3(%arg0: i32, %arg1: i32) -> (i32, i32) {
    %c0_i32 = arith.constant 0 : i32
    %c0_i32_0 = arith.constant 0 : i32
    %c0_i32_1 = arith.constant 0 : i32
    return %c0_i32, %c0_i32_0 : i32, i32
  }
  func.func @transform_4(%arg0: i32, %arg1: i32) -> (i32, i32) {
    %c0_i32 = arith.constant 0 : i32
    %c0_i32_0 = arith.constant 0 : i32
    %c0_i32_1 = arith.constant 0 : i32
    return %c0_i32, %c0_i32_0 : i32, i32
  }
  func.func @transform_5(%arg0: i32, %arg1: i32) -> (i32, i32) {
    %c0_i32 = arith.constant 0 : i32
    %c0_i32_0 = arith.constant 0 : i32
    %c0_i32_1 = arith.constant 0 : i32
    return %c0_i32, %c0_i32_0 : i32, i32
  }
  func.func @transform_6(%arg0: i32, %arg1: i32) -> (i32, i32) {
    %c0_i32 = arith.constant 0 : i32
    %c0_i32_0 = arith.constant 0 : i32
    %c0_i32_1 = arith.constant 0 : i32
    return %c0_i32, %c0_i32_0 : i32, i32
  }
  func.func @transform_7(%arg0: i32, %arg1: i32) -> (i32, i32, i32) {
    %c0_i32 = arith.constant 0 : i32
    %c0_i32_0 = arith.constant 0 : i32
    return %arg0, %c0_i32, %arg1 : i32, i32, i32
  }
}

</mosaic_0001>

<bundles_post_ra>
// kernel: tpu_custom_call.1
= control target key start
LH: loop header
LB: loop body
LE: loop exit
PB: predicated region body
PF: predicated region fallthrough
CT: control target
= control target key end

     0   :  { %s1662_s24 = smov 0   ;;  %s1664_s25 = smov 0   ;;  %s2423_s0 = inlined_call_operand.vmem [shape: f32[3,1024], index: 0, kind: input, shape index: {}]   ;;  %s2424_s1 = inlined_call_operand.vmem [shape: f32[2,64,1], index: 1, kind: input, shape index: {}]   ;;  %s2425_s2 = inlined_call_operand.vmem [shape: f32[32,3], index: 2, kind: input, shape index: {}]   ;;  %s2426_s3 = inlined_call_operand.vmem [shape: f32[32,1], index: 3, kind: input, shape index: {}]   ;;  %s2427_s4 = inlined_call_operand.vmem [shape: f32[64,32], index: 4, kind: input, shape index: {}]   ;;  %s2428_s5 = inlined_call_operand.vmem [shape: f32[3,64], index: 5, kind: input, shape index: {}]   ;;  %s2429_s6 = inlined_call_operand.vmem [shape: f32[3,1], index: 6, kind: input, shape index: {}]   ;;  %s2430_s7 = inlined_call_operand.vmem [shape: f32[2,3,1024], index: 7, kind: output, shape index: {}]  }
   0x1   :  { %s1666_s26 = smov 0  }
   0x2 LB: > { %s29_s27 = sadd.s32 1, %s1613_s25  ;;  %p1478_p0 = scmp.ge.s32.totalorder %s1617_s26, 1  ;;  %s1617_s26 = sphi %s1666_s26, %s17_s26   ;;  %s1613_s25 = sphi %s1664_s25, %s2506_s25   ;;  %s1609_s24 = sphi %s1662_s24, %s2505_s24  }
   0x3   : > { %p31_p1 = scmp.ge.s32.totalorder %s29_s27, 2  ;;  %p262_p2 = scmp.lt.s32.totalorder %s1617_s26, 3 }
   0x5   : > { %s2508_s27 = smov (%p31_p1, %s29_s27), 0  ;;  %p263_p3 = pnand %p1478_p0, %p262_p2 }
   0x7   : > { %266 = sbr.rel (%p263_p3) target bundleno = 591 (0x24f), region = 48 }
   0xc   : > { %v331_v0 = vld [vmem:[%s2425_s2 + $0x18] sm:$0xff]  ;;  %v330_v1 = vld [vmem:[%s2425_s2 + $0x10] sm:$0xff]  ;;  %v1619_v2 = vmov 1   ;;  %v1620_v3 = vmov 0   ;;  %v1621_v4 = vmov 2   ;;  %v329_v5 = vld [vmem:[%s2425_s2 + $0x8] sm:$0xff] }
   0xd   : > { %1586 = vset.pattern.permute.xlu0 %v1619_v2  ;;  %1588 = vset.pattern.permute.xlu1 %v1620_v3  ;;  %v328_v6 = vld [vmem:[%s2425_s2] sm:$0xff]  ;;  %p309_p4 = scmp.lt.s32.totalorder %s1609_s24, 1  ;;  %v334_v7 = vld [vmem:[%s2426_s3 + $0x10] sm:$0xff]  ;;  %v335_v9 = vld [vmem:[%s2426_s3 + $0x18] sm:$0xff]  ;;  %vm764_vm0 = vcmask 261120   ;;  %vm1188_vm1 = vcmask 523264  }
   0xe   : > { %1590 = vset.pattern.permute.xlu2 %v1621_v4  ;;  %429 = vperm.xlu0 %1586, %v331_v0   ;;  %v333_v11 = vld [vmem:[%s2426_s3 + $0x8] sm:$0xff]  ;;  %v332_v12 = vld [vmem:[%s2426_s3] sm:$0xff]  ;;  %v326_v26 = vld [vmem:[%s2423_s0 + $0x10] sm:$0x77]  ;;  %vm1364_vm2 = vcmask 1043456  }
   0xf   : > { %348 = vperm.xlu1 %1588, %v330_v1   ;;  %533 = vperm.xlu2 %1590, %v331_v0   ;;  %s2510_s24 = smov (!%p309_p4, %s1609_s24), 1  ;;  %v1182_v19 = vld [vmem:[%s2429_s6] sm:$0x7]  ;;  %v325_v22 = vld [vmem:[%s2423_s0 + $0x8] sm:$0x77]  ;;  %v364_v35 = vperm.slane %v326_v26, 0 }
  0x10   : > { %s1557_s15 = sshll.u32 %s2510_s24, 6  ;;  %v324_v21 = vld [vmem:[%s2423_s0] sm:$0x77]  ;;  %v362_v25 = vperm.slane %v325_v22, 0  ;;  %v538_v30 = vperm.slane %v325_v22, 2  ;;  %v363_v31 = vperm.slane %v325_v22, 4 }
  0x11   : > { %s313_s18 = scalar_lea.vmem %s2424_s1, %s1557_s15  ;;  %v360_v23 = vperm.slane %v324_v21, 0  ;;  %v361_v24 = vperm.slane %v324_v21, 4  ;;  %v536_v27 = vperm.slane %v324_v21, 2  ;;  %v537_v28 = vperm.slane %v324_v21, 6  ;;  %v327_v36 = vld [vmem:[%s2423_s0 + $0x18] sm:$0x77] }
  0x12   : > { %v723_v8 = vld [vmem:[%s313_s18 + $0x38] sm:$0xff]  ;;  %v720_v10 = vld [vmem:[%s313_s18 + $0x20] sm:$0xff]  ;;  %v717_v13 = vld [vmem:[%s313_s18 + $0x8] sm:$0xff]  ;;  %v539_v34 = vperm.slane %v325_v22, 6  ;;  %v432_v37 = vperm.slane %v324_v21, 1  ;;  %v433_v38 = vperm.slane %v324_v21, 5 }
  0x13   : > { %v722_v14 = vld [vmem:[%s313_s18 + $0x30] sm:$0xff]  ;;  %v721_v15 = vld [vmem:[%s313_s18 + $0x28] sm:$0xff]  ;;  %v719_v16 = vld [vmem:[%s313_s18 + $0x18] sm:$0xff]  ;;  %v1730_v32 = vperm.slane %v360_v23, 0  ;;  %v1732_v33 = vperm.slane %v361_v24, 0  ;;  %v1737_v39 = vperm.slane %v362_v25, 0 }
  0x14   : > { %v718_v17 = vld [vmem:[%s313_s18 + $0x10] sm:$0xff]  ;;  %v716_v18 = vld [vmem:[%s313_s18] sm:$0xff]  ;;  %v434_v40 = vperm.slane %v325_v22, 1  ;;  %v1739_v41 = vperm.slane %v536_v27, 2  ;;  %v1741_v42 = vperm.slane %v537_v28, 2  ;;  %v540_v43 = vperm.slane %v326_v26, 2 }
  0x15   : > { %v541_v44 = vperm.slane %v326_v26, 6  ;;  %v1743_v45 = vperm.slane %v538_v30, 2  ;;  %v1745_v46 = vperm.slane %v363_v31, 0  ;;  %v542_v47 = vperm.slane %v327_v36, 2  ;;  %s1558_s15 = sshll.u32 %s2510_s24, 5 }
  0x16   : > { %1587 = vset.pattern.permute.xlu0 %v1620_v3  ;;  %v543_v48 = vperm.slane %v327_v36, 6  ;;  %v435_v49 = vperm.slane %v325_v22, 5  ;;  %v1747_v50 = vperm.slane %v539_v34, 2  ;;  %v1749_v51 = vperm.slane %v364_v35, 0  ;;  %s322_s18 = scalar_lea.vmem %s2430_s7, %s1558_s15 }
  0x17   : > { %1589 = vset.pattern.permute.xlu1 %v1619_v2  ;;  %1591 = vset.pattern.permute.xlu2 %v1620_v3  ;;  %2451 = vst [vmem:[#allocation2_spill] sm:$0xff] %v1745_v46  ;;  %v365_v52 = vperm.slane %v326_v26, 4  ;;  %v1751_v53 = vperm.slane %v432_v37, 1  ;;  %v1753_v54 = vperm.slane %v433_v38, 1  ;;  %v1755_v55 = vperm.slane %v434_v40, 1 }
  0x18   : > { %353 = vperm.xlu0 %1587, %v331_v0   ;;  %425 = vperm.xlu1 %1589, %v330_v1   ;;  %v366_v56 = vperm.slane %v327_v36, 0  ;;  %v436_v57 = vperm.slane %v326_v26, 1  ;;  %v1757_v58 = vperm.slane %v540_v43, 2  ;;  %v1759_v59 = vperm.slane %v541_v44, 2 }
  0x19   : > { %343 = vperm.xlu2 %1591, %v329_v5   ;;  %v367_v60 = vperm.slane %v327_v36, 4  ;;  %v437_v62 = vperm.slane %v326_v26, 5  ;;  %v438_v63 = vperm.slane %v327_v36, 1  ;;  %v1761_v0 = vperm.slane %v542_v47, 2 }
  0x1a   : > { %2452 = vst [vmem:[#allocation3_spill] sm:$0xff] %v1759_v59 }
  0x1b   : > { %2453 = vst [vmem:[#allocation4_spill] sm:$0xff] %v1761_v0 }
  0x20   : > { %421 = vperm.xlu1 %1589, %v329_v5   ;;  %338 = vperm.xlu0 %1587, %v328_v6  }
  0x21   : > { %1592 = vset.pattern.permute.xlu2 %v1621_v4 }
  0x22   : > { %529 = vperm.xlu2 %1592, %v330_v1   ;;  %v1763_v1 = vperm.slane %v543_v48, 2 }
  0x24   : > { %2454 = vst [vmem:[#allocation5_spill] sm:$0xff] %v1763_v1 }
  0x28   : > { %417 = vperm.xlu1 %1589, %v328_v6   ;;  %636 = vperm.xlu0 %1587, %v334_v7  }
  0x2a   : > { %525 = vperm.xlu2 %1592, %v329_v5   ;;  %v1773_v5 = vperm.slane %v365_v52, 0 }
  0x30   : > { %1593 = vset.pattern.permute.xlu1 %v1620_v3  ;;  %761 = vperm.xlu0 %1587, %v723_v8  }
  0x31   : > { %641 = vperm.xlu1 %1593, %v335_v9   ;;  %v1779_v9 = vperm.slane %v435_v49, 1 }
  0x32   : > { %521 = vperm.xlu2 %1592, %v328_v6   ;;  %v439_v6 = vperm.slane %v327_v36, 5 }
  0x34   : > { %v1823_v24 = vperm.slane %v439_v6, 1 }
  0x36   : > { %2464 = vst [vmem:[#allocation15_spill] sm:$0xff] %v1823_v24 }
  0x38   : > { %746 = vperm.xlu0 %1587, %v720_v10  }
  0x39   : > { %631 = vperm.xlu1 %1593, %v333_v11   ;;  %v1785_v11 = vperm.slane %v366_v56, 0 }
  0x3a   : > { %1594 = vset.pattern.permute.xlu2 %v1620_v3 }
  0x3b   : > { %626 = vperm.xlu2 %1594, %v332_v12   ;;  %2455 = vst [vmem:[#allocation6_spill] sm:$0xff] %v1785_v11  ;;  %v1787_v12 = vperm.slane %v436_v57, 1 }
  0x3d   : > { %2456 = vst [vmem:[#allocation7_spill] sm:$0xff] %v1787_v12 }
  0x40   : > { %731 = vperm.xlu0 %1587, %v717_v13  }
  0x41   : > { %756 = vperm.xlu1 %1593, %v722_v14  }
  0x43   : > { %751 = vperm.xlu2 %1594, %v721_v15   ;;  %v1797_v15 = vperm.slane %v367_v60, 0 }
  0x45   : > { %2459 = vst [vmem:[#allocation10_spill] sm:$0xff] %v1797_v15 }
  0x49   : > { %741 = vperm.xlu1 %1593, %v719_v16   ;;  %v1799_v16 = vperm.slane %v437_v62, 1 }
  0x4b   : > { %736 = vperm.xlu2 %1594, %v718_v17   ;;  %2460 = vst [vmem:[#allocation11_spill] sm:$0xff] %v1799_v16  ;;  %v1801_v17 = vperm.slane %v438_v63, 1 }
  0x4d   : > { %2461 = vst [vmem:[#allocation12_spill] sm:$0xff] %v1801_v17 }
  0x51   : > { %726 = vperm.xlu1 %1593, %v716_v18  }
  0x53   : > { %1185 = vperm.xlu2 %1594, %v1182_v19  }
  0x69   : > { %v1717_v20 = vpop.permute.xlu2 %533 }
  0x6a   : > { %v1767_v3 = vmul.f32 %v1739_v41, %v1717_v20  ;;  %v1771_v4 = vmul.f32 %v1741_v42, %v1717_v20  ;;  %v1777_v8 = vmul.f32 %v1743_v45, %v1717_v20  ;;  %v1783_v10 = vmul.f32 %v1747_v50, %v1717_v20 }
  0x6b   : > { %v1791_v13 = vmul.f32 %v1757_v58, %v1717_v20  ;;  %v1795_v14 = vmul.f32 %v1759_v59, %v1717_v20  ;;  %v1805_v18 = vmul.f32 %v1761_v0, %v1717_v20  ;;  %v1809_v19 = vmul.f32 %v1763_v1, %v1717_v20 }
  0x6d   : > { %2457 = vst [vmem:[#allocation8_spill] sm:$0xff] %v1791_v13 }
  0x6e   : > { %2458 = vst [vmem:[#allocation9_spill] sm:$0xff] %v1795_v14 }
  0x6f   : > { %2462 = vst [vmem:[#allocation13_spill] sm:$0xff] %v1805_v18 }
  0x70   : > { %2463 = vst [vmem:[#allocation14_spill] sm:$0xff] %v1809_v19 }
  0x73   : > { %v1728_v29 = vpop.permute.xlu2 %343 }
  0x74   : > { %v1813_v21 = vmul.f32 %v1730_v32, %v1728_v29  ;;  %v1817_v22 = vmul.f32 %v1732_v33, %v1728_v29  ;;  %v1821_v23 = vmul.f32 %v1737_v39, %v1728_v29  ;;  %v1836_v27 = vmul.f32 %v1745_v46, %v1728_v29 }
  0x75   : > { %v1849_v34 = vmul.f32 %v1749_v51, %v1728_v29 }
  0x77   : > { %2467 = vst [vmem:[#allocation18_spill] sm:$0xff] %v1849_v34 }
  0x7c   : > { %v530_v7 = vpop.permute.xlu2 %529 }
  0x7d   : > { %v1826_v25 = vmul.f32 %v1739_v41, %v530_v7  ;;  %v1829_v20 = vmul.f32 %v1741_v42, %v530_v7  ;;  %v1832_v26 = vmul.f32 %v1743_v45, %v530_v7  ;;  %v1839_v28 = vmul.f32 %v1747_v50, %v530_v7 }
  0x7e   : > { %v1842_v30 = vmul.f32 %v1757_v58, %v530_v7  ;;  %v1845_v31 = vmul.f32 %v1759_v59, %v530_v7  ;;  %v1854_v37 = vmul.f32 %v1761_v0, %v530_v7  ;;  %v1857_v38 = vmul.f32 %v1763_v1, %v530_v7 }
  0x80   : > { %v430_v61 = vpop.permute.xlu0 %429  ;;  %2465 = vst [vmem:[#allocation16_spill] sm:$0xff] %v1842_v30 }
  0x81   : > { %v349_v2 = vpop.permute.xlu1 %348  ;;  %2466 = vst [vmem:[#allocation17_spill] sm:$0xff] %v1845_v31  ;;  %v480_v35 = vmul.f32 %v1751_v53, %v430_v61  ;;  %v481_v36 = vmul.f32 %v1753_v54, %v430_v61  ;;  %v482_v40 = vmul.f32 %v1755_v55, %v430_v61  ;;  %v483_v43 = vmul.f32 %v1779_v9, %v430_v61 }
  0x82   : > { %2468 = vst [vmem:[#allocation19_spill] sm:$0xff] %v1854_v37  ;;  %v400_v44 = vmul.f32 %v1730_v32, %v349_v2  ;;  %v401_v47 = vmul.f32 %v1732_v33, %v349_v2  ;;  %v402_v52 = vmul.f32 %v1737_v39, %v349_v2  ;;  %v403_v56 = vmul.f32 %v1745_v46, %v349_v2 }
  0x83   : > { %2469 = vst [vmem:[#allocation20_spill] sm:$0xff] %v1857_v38  ;;  %v484_v57 = vmul.f32 %v1787_v12, %v430_v61  ;;  %v1869_v60 = vmul.f32 %v1799_v16, %v430_v61  ;;  %v486_v63 = vmul.f32 %v1801_v17, %v430_v61  ;;  %v1874_v6 = vmul.f32 %v1823_v24, %v430_v61 }
  0x84   : > { %v1877_v7 = vmul.f32 %v1749_v51, %v349_v2  ;;  %v1879_v1 = vpop.permute.xlu2 %525  ;;  %v1891_v30 = vmul.f32 %v1773_v5, %v349_v2  ;;  %v1894_v59 = vmul.f32 %v1785_v11, %v349_v2  ;;  %v1901_v17 = vmul.f32 %v1797_v15, %v349_v2 }
  0x85   : > { %2471 = vst [vmem:[#allocation22_spill] sm:$0xff] %v1874_v6  ;;  %v569_v16 = vmul.f32 %v1741_v42, %v1879_v1  ;;  %v570_v18 = vmul.f32 %v1743_v45, %v1879_v1  ;;  %v1919_v6 = vmul.f32 %v1797_v15, %v1728_v29 }
  0x86   : > { %2472 = vst [vmem:[#allocation23_spill] sm:$0xff] %v1877_v7  ;;  %v568_v7 = vmul.f32 %v1739_v41, %v1879_v1 }
  0x87   : > { %2473 = vst [vmem:[#allocation24_spill] sm:$0xff] %v1891_v30  ;;  %v571_v30 = vmul.f32 %v1747_v50, %v1879_v1 }
  0x88   : > { %2474 = vst [vmem:[#allocation25_spill] sm:$0xff] %v1894_v59 }
  0x89   : > { %2475 = vst [vmem:[#allocation26_spill] sm:$0xff] %v1901_v17  ;;  %v1915_v17 = vmul.f32 %v1785_v11, %v1728_v29 }
  0x8a   : > { %v354_v48 = vpop.permute.xlu0 %353  ;;  %v1863_v49 = vpop.permute.xlu1 %425 }
  0x8b   : > { %2470 = vst [vmem:[#allocation21_spill] sm:$0xff] %v1863_v49  ;;  %v408_v62 = vmul.f32 %v1730_v32, %v354_v48  ;;  %v409_v0 = vmul.f32 %v1732_v33, %v354_v48  ;;  %v410_v34 = vmul.f32 %v1737_v39, %v354_v48  ;;  %v411_v38 = vmul.f32 %v1745_v46, %v354_v48 }
  0x8c   : > { %v472_v37 = vmul.f32 %v1751_v53, %v1863_v49  ;;  %v473_v31 = vmul.f32 %v1753_v54, %v1863_v49  ;;  %v474_v61 = vmul.f32 %v1755_v55, %v1863_v49  ;;  %v475_v24 = vmul.f32 %v1779_v9, %v1863_v49 }
  0x8d   : > { %v512_v19 = vadd.f32 %v480_v35, %v408_v62  ;;  %v1911_v35 = vmul.f32 %v1773_v5, %v1728_v29  ;;  %v513_v62 = vadd.f32 %v481_v36, %v409_v0  ;;  %v514_v59 = vadd.f32 %v482_v40, %v410_v34 }
  0x8e   : > { %v515_v14 = vadd.f32 %v483_v43, %v411_v38  ;;  %v504_v12 = vadd.f32 %v472_v37, %v400_v44  ;;  %v505_v49 = vadd.f32 %v473_v31, %v401_v47  ;;  %v506_v2 = vadd.f32 %v474_v61, %v402_v52 }
  0x8f   : > { %2476 = vst [vmem:[#allocation27_spill] sm:$0xff] %v1911_v35  ;;  %v1926_v35 = vadd.f32 %v1767_v3, %v512_v19  ;;  %v507_v0 = vadd.f32 %v475_v24, %v403_v56  ;;  %v412_v34 = vmul.f32 %v1749_v51, %v354_v48  ;;  %v1931_v31 = vmul.f32 %v1757_v58, %v1879_v1  ;;  %v1955_v56 = vpop.permute.xlu2 %521 }
  0x90   : > { %v1942_v19 = vadd.f32 %v1771_v4, %v513_v62  ;;  %v1945_v24 = vadd.f32 %v1777_v8, %v514_v59  ;;  %v1948_v38 = vadd.f32 %v1783_v10, %v515_v14  ;;  %v608_v40 = vadd.f32 %v1826_v25, %v504_v12  ;;  %v2478_v62 = vld [vmem:[#allocation8_spill] sm:$0xff] }
  0x91   : > { %v609_v43 = vadd.f32 %v1829_v20, %v505_v49  ;;  %v610_v44 = vadd.f32 %v1832_v26, %v506_v2  ;;  %v413_v47 = vmul.f32 %v1773_v5, %v354_v48  ;;  %v414_v52 = vmul.f32 %v1785_v11, %v354_v48  ;;  %v2493_v11 = vld [vmem:[#allocation26_spill] sm:$0xff] }
  0x92   : > { %v1921_v13 = vpop.permute.xlu1 %421  ;;  %v1923_v46 = vpop.permute.xlu0 %338  ;;  %v611_v4 = vadd.f32 %v1839_v28, %v507_v0  ;;  %v560_v14 = vmul.f32 %v1739_v41, %v1955_v56  ;;  %v516_v25 = vadd.f32 %v484_v57, %v412_v34  ;;  %v415_v20 = vmul.f32 %v1797_v15, %v354_v48  ;;  %v2480_v2 = vld [vmem:[#allocation21_spill] sm:$0xff]  ;;  %v2481_v0 = vld [vmem:[#allocation7_spill] sm:$0xff] }
  0x93   : > { %v464_v36 = vmul.f32 %v1751_v53, %v1921_v13  ;;  %v465_v29 = vmul.f32 %v1753_v54, %v1921_v13  ;;  %v466_v37 = vmul.f32 %v1755_v55, %v1921_v13  ;;  %v467_v3 = vmul.f32 %v1779_v9, %v1921_v13 }
  0x94   : > { %v384_v26 = vmul.f32 %v1730_v32, %v1923_v46  ;;  %v561_v28 = vmul.f32 %v1741_v42, %v1955_v56  ;;  %v386_v41 = vmul.f32 %v1737_v39, %v1923_v46  ;;  %v518_v48 = vadd.f32 %v486_v63, %v414_v52 }
  0x95   : > { %v496_v59 = vadd.f32 %v464_v36, %v1813_v21  ;;  %v497_v8 = vadd.f32 %v465_v29, %v1817_v22  ;;  %v498_v10 = vadd.f32 %v466_v37, %v1821_v23  ;;  %v499_v12 = vadd.f32 %v467_v3, %v1836_v27  ;;  %v2482_v36 = vld [vmem:[#allocation9_spill] sm:$0xff] }
  0x96   : > { %v562_v21 = vmul.f32 %v1743_v45, %v1955_v56  ;;  %v563_v22 = vmul.f32 %v1747_v50, %v1955_v56  ;;  %v385_v23 = vmul.f32 %v1732_v33, %v1923_v46  ;;  %v517_v27 = vadd.f32 %v1869_v60, %v413_v47  ;;  %v2477_v45 = vld [vmem:[#allocation2_spill] sm:$0xff]  ;;  %v2483_v37 = vld [vmem:[#allocation13_spill] sm:$0xff]  ;;  %v2484_v47 = vld [vmem:[#allocation11_spill] sm:$0xff] }
  0x97   : > { %v1980_v32 = vadd.f32 %v568_v7, %v496_v59  ;;  %v1982_v42 = vadd.f32 %v569_v16, %v497_v8  ;;  %v1984_v57 = vadd.f32 %v570_v18, %v498_v10  ;;  %v387_v50 = vmul.f32 %v2477_v45, %v1923_v46  ;;  %v2479_v60 = vld [vmem:[#allocation22_spill] sm:$0xff]  ;;  %v2485_v59 = vld [vmem:[#allocation12_spill] sm:$0xff] }
  0x98   : > { %v1990_v33 = vadd.f32 %v571_v30, %v499_v12  ;;  %v1993_v39 = vadd.f32 %v2478_v62, %v516_v25  ;;  %v519_v63 = vadd.f32 %v2479_v60, %v415_v20  ;;  %v476_v7 = vmul.f32 %v2481_v0, %v2480_v2  ;;  %v2488_v45 = vld [vmem:[#allocation14_spill] sm:$0xff] }
  0x99   : > { %v621_v29 = vadd.f32 %v2482_v36, %v517_v27  ;;  %v2008_v3 = vadd.f32 %v2483_v37, %v518_v48  ;;  %v477_v52 = vmul.f32 %v2484_v47, %v2480_v2  ;;  %v2487_v27 = vld [vmem:[#allocation15_spill] sm:$0xff]  ;;  %v468_v60 = vmul.f32 %v2481_v0, %v1921_v13 }
  0x9a   : > { %v1978_v49 = vpop.permute.xlu1 %417  ;;  %v1988_v61 = vpop.permute.xlu0 %636  ;;  %v479_v48 = vmul.f32 %v2487_v27, %v2480_v2  ;;  %v2020_v62 = vadd.f32 %v2488_v45, %v519_v63  ;;  %v2492_v45 = vld [vmem:[#allocation16_spill] sm:$0xff] }
  0x9b   : > { %v456_v16 = vmul.f32 %v1751_v53, %v1978_v49  ;;  %v457_v18 = vmul.f32 %v1753_v54, %v1978_v49  ;;  %v458_v34 = vmul.f32 %v1755_v55, %v1978_v49  ;;  %v459_v30 = vmul.f32 %v1779_v9, %v1978_v49  ;;  %v2486_v9 = vld [vmem:[#allocation23_spill] sm:$0xff] }
  0x9c   : > { %v478_v53 = vmul.f32 %v2485_v59, %v2480_v2  ;;  %v660_v8 = vadd.f32 %v1988_v61, %v608_v40  ;;  %v661_v54 = vadd.f32 %v1988_v61, %v609_v43  ;;  %v508_v20 = vadd.f32 %v476_v7, %v2486_v9  ;;  %v2489_v43 = vld [vmem:[#allocation3_spill] sm:$0xff]  ;;  %v2491_v7 = vld [vmem:[#allocation25_spill] sm:$0xff] }
  0x9d   : > { %v488_v10 = vadd.f32 %v456_v16, %v384_v26  ;;  %v489_v55 = vadd.f32 %v457_v18, %v385_v23  ;;  %v490_v12 = vadd.f32 %v458_v34, %v386_v41  ;;  %v491_v25 = vadd.f32 %v459_v30, %v387_v50  ;;  %v2490_v50 = vld [vmem:[#allocation24_spill] sm:$0xff] }
  0x9e   : > { %v469_v40 = vmul.f32 %v2484_v47, %v1921_v13  ;;  %v573_v26 = vmul.f32 %v2489_v43, %v1879_v1  ;;  %v509_v16 = vadd.f32 %v477_v52, %v2490_v50  ;;  %v510_v18 = vadd.f32 %v478_v53, %v2491_v7  ;;  %v2034_v43 = vpop.permute.xlu2 %626 }
  0x9f   : > { %v592_v23 = vadd.f32 %v560_v14, %v488_v10  ;;  %v593_v41 = vadd.f32 %v561_v28, %v489_v55  ;;  %v692_v34 = vmax.f32 %v660_v8, 0.0  ;;  %v693_v2 = vmax.f32 %v661_v54, 0.0  ;;  %v2495_v8 = vld [vmem:[#allocation19_spill] sm:$0xff] }
  0xa0   : > { %v662_v63 = vadd.f32 %v1988_v61, %v610_v44  ;;  %v663_v30 = vadd.f32 %v1988_v61, %v611_v4  ;;  %v594_v37 = vadd.f32 %v562_v21, %v490_v12  ;;  %v595_v9 = vadd.f32 %v563_v22, %v491_v25  ;;  %v2494_v21 = vld [vmem:[#allocation17_spill] sm:$0xff] }
  0xa1   : > { %v612_v15 = vadd.f32 %v2492_v45, %v508_v20  ;;  %v511_v47 = vadd.f32 %v479_v48, %v2493_v11  ;;  %v2041_v44 = vadd.f32 %v2034_v43, %v592_v23  ;;  %v2044_v4 = vadd.f32 %v2034_v43, %v593_v41  ;;  %v2499_v45 = vld [vmem:[#allocation4_spill] sm:$0xff] }
  0xa2   : > { %v613_v22 = vadd.f32 %v2494_v21, %v509_v16  ;;  %v614_v11 = vadd.f32 %v2495_v8, %v510_v18  ;;  %v694_v12 = vmax.f32 %v662_v63, 0.0  ;;  %v695_v20 = vmax.f32 %v663_v30, 0.0  ;;  %v2497_v18 = vld [vmem:[#allocation18_spill] sm:$0xff]  ;;  %v2498_v30 = vld [vmem:[#allocation27_spill] sm:$0xff] }
  0xa3   : > { %v642_v36 = vpop.permute.xlu1 %641  ;;  %v2056_v48 = vadd.f32 %v1988_v61, %v612_v15  ;;  %v676_v50 = vmax.f32 %v2041_v44, 0.0  ;;  %v677_v15 = vmax.f32 %v2044_v4, 0.0  ;;  %v500_v63 = vadd.f32 %v468_v60, %v2497_v18 }
  0xa4   : > { %v668_v14 = vadd.f32 %v642_v36, %v1926_v35  ;;  %v669_v28 = vadd.f32 %v642_v36, %v1942_v19  ;;  %v670_v52 = vadd.f32 %v642_v36, %v1945_v24  ;;  %v671_v53 = vadd.f32 %v642_v36, %v1948_v38  ;;  %v2496_v38 = vld [vmem:[#allocation20_spill] sm:$0xff] }
  0xa5   : > { %v2049_v19 = vadd.f32 %v2034_v43, %v594_v37  ;;  %v2052_v24 = vadd.f32 %v2034_v43, %v595_v9  ;;  %v615_v25 = vadd.f32 %v2496_v38, %v511_v47  ;;  %v2059_v23 = vadd.f32 %v1988_v61, %v613_v22 }
  0xa6   : > { %v700_v54 = vmax.f32 %v668_v14, 0.0  ;;  %v701_v10 = vmax.f32 %v669_v28, 0.0  ;;  %v702_v55 = vmax.f32 %v670_v52, 0.0  ;;  %v703_v35 = vmax.f32 %v671_v53, 0.0 }
  0xa7   : > { %v2062_v41 = vadd.f32 %v1988_v61, %v614_v11  ;;  %v2066_v16 = vadd.f32 %v642_v36, %v1993_v39  ;;  %v2068_v47 = vadd.f32 %v642_v36, %v621_v29  ;;  %v2071_v7 = vadd.f32 %v1988_v61, %v615_v25 }
  0xa8   : > { %801 = vmatpush.msra.mxu0 %v700_v54  ;;  %842 = vmatpush.msra.mxu1 %v701_v10  ;;  %v501_v37 = vadd.f32 %v469_v40, %v2498_v30  ;;  %v470_v9 = vmul.f32 %v2485_v59, %v1921_v13  ;;  %v678_v29 = vmax.f32 %v2049_v19, 0.0  ;;  %v574_v61 = vmul.f32 %v2499_v45, %v1879_v1 }
  0xa9   : > { %883 = vmatpush.msra.mxu2 %v702_v55  ;;  %924 = vmatpush.msra.mxu3 %v703_v35  ;;  %v604_v53 = vadd.f32 %v1931_v31, %v500_v63  ;;  %v2501_v55 = vld [vmem:[#allocation11_spill] sm:$0xff]  ;;  %v463_v63 = vmul.f32 %v2487_v27, %v1978_v49 }
  0xaa   : > { %802 = vmatpush.msra.mxu0 %v692_v34  ;;  %843 = vmatpush.msra.mxu1 %v693_v2  ;;  %v471_v34 = vmul.f32 %v2487_v27, %v1921_v13  ;;  %v2500_v2 = vld [vmem:[#allocation5_spill] sm:$0xff]  ;;  %v605_v44 = vadd.f32 %v573_v26, %v501_v37  ;;  %v502_v4 = vadd.f32 %v470_v9, %v1915_v17 }
  0xab   : > { %884 = vmatpush.msra.mxu2 %v694_v12  ;;  %925 = vmatpush.msra.mxu3 %v695_v20  ;;  %v632_v39 = vpop.permute.xlu1 %631  ;;  %v575_v14 = vmul.f32 %v2500_v2, %v1879_v1  ;;  %v674_v1 = vadd.f32 %v642_v36, %v2008_v3  ;;  %v388_v17 = vmul.f32 %v1749_v51, %v1923_v46  ;;  %v696_v3 = vmax.f32 %v2056_v48, 0.0 }
  0xac   : > { %v652_v60 = vadd.f32 %v632_v39, %v1980_v32  ;;  %v653_v40 = vadd.f32 %v632_v39, %v1982_v42  ;;  %v654_v28 = vadd.f32 %v632_v39, %v1984_v57  ;;  %v655_v52 = vadd.f32 %v632_v39, %v1990_v33  ;;  %v2102_v33 = vld [vmem:[%s2427_s4] sm:$0xff] }
  0xad   : > { %v503_v21 = vadd.f32 %v471_v34, %v1919_v6  ;;  %v675_v32 = vadd.f32 %v642_v36, %v2020_v62  ;;  %v656_v42 = vadd.f32 %v632_v39, %v604_v53  ;;  %v606_v54 = vadd.f32 %v574_v61, %v502_v4  ;;  %v710_v53 = vld [vmem:[%s2427_s4 + $0x10] sm:$0xff]  ;;  %v713_v4 = vld [vmem:[%s2427_s4 + $0x28] sm:$0xff] }
  0xae   : > { %v684_v22 = vmax.f32 %v652_v60, 0.0  ;;  %v685_v13 = vmax.f32 %v653_v40, 0.0  ;;  %v686_v8 = vmax.f32 %v654_v28, 0.0  ;;  %v687_v11 = vmax.f32 %v655_v52, 0.0 }
  0xaf   : > { %v679_v57 = vmax.f32 %v2052_v24, 0.0  ;;  %v657_v31 = vadd.f32 %v632_v39, %v605_v44  ;;  %v460_v6 = vmul.f32 %v2481_v0, %v1978_v49  ;;  %v658_v62 = vadd.f32 %v632_v39, %v606_v54  ;;  %v2502_v24 = vld [vmem:[#allocation3_spill] sm:$0xff]  ;;  %v712_v44 = vld [vmem:[%s2427_s4 + $0x20] sm:$0xff] }
  0xb0   : > { %803 = vmatpush.msra.mxu0 %v684_v22  ;;  %844 = vmatpush.msra.mxu1 %v685_v13  ;;  %v607_v26 = vadd.f32 %v575_v14, %v503_v21  ;;  %v564_v36 = vmul.f32 %v1757_v58, %v1955_v56  ;;  %v704_v51 = vmax.f32 %v2066_v16, 0.0  ;;  %v389_v0 = vmul.f32 %v1773_v5, %v1923_v46  ;;  %v2503_v58 = vld [vmem:[#allocation6_spill] sm:$0xff]  ;;  %v714_v21 = vld [vmem:[%s2427_s4 + $0x30] sm:$0xff]  ;;  %v715_v22 = vld [vmem:[%s2427_s4 + $0x38] sm:$0xff] }
  0xb1   : > { %885 = vmatpush.msra.mxu2 %v686_v8  ;;  %926 = vmatpush.msra.mxu3 %v687_v11  ;;  %v492_v10 = vadd.f32 %v460_v6, %v388_v17  ;;  %v461_v35 = vmul.f32 %v2501_v55, %v1978_v49  ;;  %v705_v12 = vmax.f32 %v2068_v47, 0.0  ;;  %v565_v38 = vmul.f32 %v2502_v24, %v1955_v56 }
  0xb2   : > { %804 = vmatpush.msra.mxu0 %v676_v50  ;;  %845 = vmatpush.msra.mxu1 %v677_v15  ;;  %v659_v19 = vadd.f32 %v632_v39, %v607_v26  ;;  %v390_v25 = vmul.f32 %v2503_v58, %v1923_v46  ;;  %v706_v5 = vmax.f32 %v674_v1, 0.0  ;;  %v462_v50 = vmul.f32 %v2485_v59, %v1978_v49  ;;  %v2504_v15 = vld [vmem:[#allocation10_spill] sm:$0xff] }
  0xb3   : > { %886 = vmatpush.msra.mxu2 %v678_v29  ;;  %927 = vmatpush.msra.mxu3 %v679_v57  ;;  %v596_v20 = vadd.f32 %v564_v36, %v492_v10  ;;  %v493_v48 = vadd.f32 %v461_v35, %v389_v0  ;;  %v707_v16 = vmax.f32 %v675_v32, 0.0  ;;  %v566_v47 = vmul.f32 %v2499_v45, %v1955_v56  ;;  %v2257_v24 = vpop.permute.xlu1 %756 }
  0xb4   : > { %1483 = vmatmul.msk.f32.vlgmr.msra.gmra.mxu0 %vm764_vm0, %v2102_v33  ;;  %1491 = vmatmul.msk.f32.vlgmr.msra.gmra.mxu1 %vm764_vm0, %v2102_v33  ;;  %v391_v18 = vmul.f32 %v2504_v15, %v1923_v46  ;;  %v697_v59 = vmax.f32 %v2059_v23, 0.0  ;;  %v494_v9 = vadd.f32 %v462_v50, %v390_v25  ;;  %v698_v39 = vmax.f32 %v2062_v41, 0.0 }
  0xb5   : > { %1499 = vmatmul.msk.f32.vlgmr.msra.gmra.mxu2 %vm764_vm0, %v2102_v33  ;;  %1507 = vmatmul.msk.f32.vlgmr.msra.gmra.mxu3 %vm764_vm0, %v2102_v33  ;;  %v648_v30 = vadd.f32 %v2034_v43, %v596_v20  ;;  %v597_v37 = vadd.f32 %v565_v38, %v493_v48  ;;  %v699_v29 = vmax.f32 %v2071_v7, 0.0  ;;  %v567_v46 = vmul.f32 %v2500_v2, %v1955_v56  ;;  %v709_v56 = vld [vmem:[%s2427_s4 + $0x8] sm:$0xff]  ;;  %v2259_v20 = vpop.permute.xlu2 %751 }
  0xb6   : > { %965 = vmatpush.msrb.mxu0 %v704_v51  ;;  %1006 = vmatpush.msrb.mxu1 %v705_v12  ;;  %v495_v45 = vadd.f32 %v463_v63, %v391_v18  ;;  %v688_v49 = vmax.f32 %v656_v42, 0.0  ;;  %v689_v27 = vmax.f32 %v657_v31, 0.0  ;;  %v598_v61 = vadd.f32 %v566_v47, %v494_v9 }
  0xb7   : > { %1047 = vmatpush.msrb.mxu2 %v706_v5  ;;  %1088 = vmatpush.msrb.mxu3 %v707_v16  ;;  %v649_v23 = vadd.f32 %v2034_v43, %v597_v37  ;;  %v690_v34 = vmax.f32 %v658_v62, 0.0  ;;  %v691_v14 = vmax.f32 %v659_v19, 0.0  ;;  %v680_v41 = vmax.f32 %v648_v30, 0.0  ;;  %v2255_v19 = vpop.permute.xlu0 %761 }
  0xb8   : > { %966 = vmatpush.msrb.mxu0 %v696_v3  ;;  %1007 = vmatpush.msrb.mxu1 %v697_v59  ;;  %v599_v60 = vadd.f32 %v567_v46, %v495_v45  ;;  %v650_v40 = vadd.f32 %v2034_v43, %v598_v61 }
  0xb9   : > { %1048 = vmatpush.msrb.mxu2 %v698_v39  ;;  %1089 = vmatpush.msrb.mxu3 %v699_v29  ;;  %v681_v7 = vmax.f32 %v649_v23, 0.0 }
  0xba   : > { %967 = vmatpush.msrb.mxu0 %v688_v49  ;;  %1008 = vmatpush.msrb.mxu1 %v689_v27  ;;  %v651_v2 = vadd.f32 %v2034_v43, %v599_v60  ;;  %v682_v28 = vmax.f32 %v650_v40, 0.0  ;;  %v711_v43 = vld [vmem:[%s2427_s4 + $0x18] sm:$0xff] }
  0xbb   : > { %1049 = vmatpush.msrb.mxu2 %v690_v34  ;;  %1090 = vmatpush.msrb.mxu3 %v691_v14  ;;  %v2265_v59 = vpop.permute.xlu1 %741 }
  0xbc   : > { %968 = vmatpush.msrb.mxu0 %v680_v41  ;;  %1009 = vmatpush.msrb.mxu1 %v681_v7  ;;  %v683_v52 = vmax.f32 %v651_v2, 0.0 }
  0xbd   : > { %1484 = vmatmul.msk.f32.gmra.mxu0 %vm764_vm0, %v709_v56  ;;  %1492 = vmatmul.msk.f32.gmra.mxu1 %vm764_vm0, %v709_v56  ;;  %v2273_v61 = vpop.permute.xlu2 %736 }
  0xbe   : > { %1050 = vmatpush.msrb.mxu2 %v682_v28  ;;  %1508 = vmatmul.msk.f32.gmra.mxu3 %vm764_vm0, %v709_v56 }
  0xbf   : > { %1091 = vmatpush.msrb.mxu3 %v683_v52  ;;  %1500 = vmatmul.msk.f32.gmra.mxu2 %vm764_vm0, %v709_v56  ;;  %v2261_v48 = vpop.permute.xlu0 %746 }
  0xc5   : > { %1485 = vmatmul.msk.f32.gmra.mxu0 %vm764_vm0, %v710_v53  ;;  %1493 = vmatmul.msk.f32.gmra.mxu1 %vm764_vm0, %v710_v53 }
  0xc6   : > { %1509 = vmatmul.msk.f32.gmra.mxu3 %vm764_vm0, %v710_v53 }
  0xc7   : > { %1501 = vmatmul.msk.f32.gmra.mxu2 %vm764_vm0, %v710_v53 }
  0xcd   : > { %1486 = vmatmul.msk.f32.gmra.mxu0 %vm764_vm0, %v711_v43  ;;  %1494 = vmatmul.msk.f32.gmra.mxu1 %vm764_vm0, %v711_v43 }
  0xce   : > { %1510 = vmatmul.msk.f32.gmra.mxu3 %vm764_vm0, %v711_v43 }
  0xcf   : > { %1502 = vmatmul.msk.f32.gmra.mxu2 %vm764_vm0, %v711_v43 }
  0xd5   : > { %1487 = vmatmul.msk.f32.gmra.mxu0 %vm764_vm0, %v712_v44  ;;  %1495 = vmatmul.msk.f32.gmra.mxu1 %vm764_vm0, %v712_v44 }
  0xd6   : > { %1511 = vmatmul.msk.f32.gmra.mxu3 %vm764_vm0, %v712_v44 }
  0xd7   : > { %1503 = vmatmul.msk.f32.gmra.mxu2 %vm764_vm0, %v712_v44 }
  0xdd   : > { %1488 = vmatmul.msk.f32.gmra.mxu0 %vm764_vm0, %v713_v4  ;;  %1496 = vmatmul.msk.f32.gmra.mxu1 %vm764_vm0, %v713_v4 }
  0xde   : > { %1512 = vmatmul.msk.f32.gmra.mxu3 %vm764_vm0, %v713_v4 }
  0xdf   : > { %1504 = vmatmul.msk.f32.gmra.mxu2 %vm764_vm0, %v713_v4 }
  0xe5   : > { %1489 = vmatmul.msk.f32.gmra.mxu0 %vm764_vm0, %v714_v21  ;;  %1497 = vmatmul.msk.f32.gmra.mxu1 %vm764_vm0, %v714_v21 }
  0xe6   : > { %1513 = vmatmul.msk.f32.gmra.mxu3 %vm764_vm0, %v714_v21 }
  0xe7   : > { %1505 = vmatmul.msk.f32.gmra.mxu2 %vm764_vm0, %v714_v21 }
  0xed   : > { %1490 = vmatmul.msk.f32.gmra.mxu0 %vm764_vm0, %v715_v22  ;;  %1498 = vmatmul.msk.f32.gmra.mxu1 %vm764_vm0, %v715_v22 }
  0xee   : > { %1514 = vmatmul.msk.f32.gmra.mxu3 %vm764_vm0, %v715_v22 }
  0xef   : > { %1506 = vmatmul.msk.f32.gmra.mxu2 %vm764_vm0, %v715_v22 }
  0xf5   : > { %1515 = vmatmul.msk.f32.vlgmr.msrb.gmra.mxu0 %vm764_vm0, %v2102_v33  ;;  %1523 = vmatmul.msk.f32.vlgmr.msrb.gmra.mxu1 %vm764_vm0, %v2102_v33 }
  0xf6   : > { %1539 = vmatmul.msk.f32.vlgmr.msrb.gmra.mxu3 %vm764_vm0, %v2102_v33 }
  0xf7   : > { %1531 = vmatmul.msk.f32.vlgmr.msrb.gmra.mxu2 %vm764_vm0, %v2102_v33 }
  0xfd   : > { %1516 = vmatmul.msk.f32.gmra.mxu0 %vm764_vm0, %v709_v56  ;;  %1524 = vmatmul.msk.f32.gmra.mxu1 %vm764_vm0, %v709_v56 }
  0xfe   : > { %1540 = vmatmul.msk.f32.gmra.mxu3 %vm764_vm0, %v709_v56 }
  0xff   : > { %1532 = vmatmul.msk.f32.gmra.mxu2 %vm764_vm0, %v709_v56 }
 0x105   : > { %1517 = vmatmul.msk.f32.gmra.mxu0 %vm764_vm0, %v710_v53  ;;  %1525 = vmatmul.msk.f32.gmra.mxu1 %vm764_vm0, %v710_v53 }
 0x106   : > { %1541 = vmatmul.msk.f32.gmra.mxu3 %vm764_vm0, %v710_v53 }
 0x107   : > { %1533 = vmatmul.msk.f32.gmra.mxu2 %vm764_vm0, %v710_v53 }
 0x10d   : > { %1518 = vmatmul.msk.f32.gmra.mxu0 %vm764_vm0, %v711_v43  ;;  %1526 = vmatmul.msk.f32.gmra.mxu1 %vm764_vm0, %v711_v43 }
 0x10e   : > { %1542 = vmatmul.msk.f32.gmra.mxu3 %vm764_vm0, %v711_v43 }
 0x10f   : > { %1534 = vmatmul.msk.f32.gmra.mxu2 %vm764_vm0, %v711_v43 }
 0x115   : > { %1519 = vmatmul.msk.f32.gmra.mxu0 %vm764_vm0, %v712_v44  ;;  %1527 = vmatmul.msk.f32.gmra.mxu1 %vm764_vm0, %v712_v44 }
 0x116   : > { %1543 = vmatmul.msk.f32.gmra.mxu3 %vm764_vm0, %v712_v44 }
 0x117   : > { %1535 = vmatmul.msk.f32.gmra.mxu2 %vm764_vm0, %v712_v44 }
 0x11d   : > { %1520 = vmatmul.msk.f32.gmra.mxu0 %vm764_vm0, %v713_v4  ;;  %1528 = vmatmul.msk.f32.gmra.mxu1 %vm764_vm0, %v713_v4 }
 0x11e   : > { %1544 = vmatmul.msk.f32.gmra.mxu3 %vm764_vm0, %v713_v4 }
 0x11f   : > { %1536 = vmatmul.msk.f32.gmra.mxu2 %vm764_vm0, %v713_v4 }
 0x125   : > { %1521 = vmatmul.msk.f32.gmra.mxu0 %vm764_vm0, %v714_v21  ;;  %1529 = vmatmul.msk.f32.gmra.mxu1 %vm764_vm0, %v714_v21 }
 0x126   : > { %1545 = vmatmul.msk.f32.gmra.mxu3 %vm764_vm0, %v714_v21 }
 0x127   : > { %1537 = vmatmul.msk.f32.gmra.mxu2 %vm764_vm0, %v714_v21  ;;  %v2286_v21 = vpop.permute.xlu0 %731 }
 0x12d   : > { %1522 = vmatmul.msk.f32.gmra.mxu0 %vm764_vm0, %v715_v22  ;;  %1530 = vmatmul.msk.f32.gmra.mxu1 %vm764_vm0, %v715_v22 }
 0x12e   : > { %1546 = vmatmul.msk.f32.gmra.mxu3 %vm764_vm0, %v715_v22 }
 0x12f   : > { %1538 = vmatmul.msk.f32.gmra.mxu2 %vm764_vm0, %v715_v22 }
 0x131   : > { %v2227_v13 = vpop.f32.mrf.mxu0  ;;  %v2229_v8 = vpop.f32.mrf.mxu1 }
 0x138   : > { %v2231_v11 = vpop.f32.mrf.mxu2  ;;  %v2233_v1 = vpop.f32.mrf.mxu3 }
 0x13a   : > { %v2235_v32 = vpop.f32.mrf.mxu0  ;;  %v2237_v42 = vpop.f32.mrf.mxu1 }
 0x141   : > { %v2239_v54 = vpop.f32.mrf.mxu3 }
 0x142   : > { %v2241_v57 = vpop.f32.mrf.mxu2  ;;  %v812_v31 = vpop.f32.mrf.mxu0 }
 0x143   : > { %v853_v17 = vpop.f32.mrf.mxu1  ;;  %v813_v52 = vadd.f32 %v812_v31, %v2273_v61  ;;  %v810_v31 = vadd.f32 %v2235_v32, %v2286_v21 }
 0x144   : > { %v854_v22 = vadd.f32 %v853_v17, %v2273_v61 }
 0x149   : > { %v2243_v6 = vpop.f32.mrf.mxu3 }
 0x14a   : > { %v2245_v33 = vpop.f32.mrf.mxu2  ;;  %v815_v3 = vpop.f32.mrf.mxu0 }
 0x14b   : > { %v856_v62 = vpop.f32.mrf.mxu1  ;;  %v816_v34 = vadd.f32 %v815_v3, %v2265_v59 }
 0x14c   : > { %v857_v41 = vadd.f32 %v856_v62, %v2265_v59 }
 0x151   : > { %v2247_v26 = vpop.f32.mrf.mxu3 }
 0x152   : > { %v2249_v36 = vpop.f32.mrf.mxu2  ;;  %v818_v51 = vpop.f32.mrf.mxu0 }
 0x153   : > { %v859_v10 = vpop.f32.mrf.mxu1  ;;  %v819_v46 = vadd.f32 %v818_v51, %v2261_v48 }
 0x154   : > { %v860_v27 = vadd.f32 %v859_v10, %v2261_v48  ;;  %v1141_v10 = vmax.f32 %v816_v34, 0.0 }
 0x155   : > { %v1149_v53 = vmax.f32 %v819_v46, 0.0 }
 0x156   : > { %v1150_v3 = vmax.f32 %v860_v27, 0.0 }
 0x159   : > { %v2251_v0 = vpop.f32.mrf.mxu3 }
 0x15a   : > { %v2253_v55 = vpop.f32.mrf.mxu2  ;;  %v821_v35 = vpop.f32.mrf.mxu0  ;;  %v942_v17 = vadd.f32 %v2251_v0, %v2261_v48  ;;  %v939_v0 = vadd.f32 %v2247_v26, %v2265_v59 }
 0x15b   : > { %v862_v12 = vpop.f32.mrf.mxu1  ;;  %v822_v9 = vadd.f32 %v821_v35, %v2259_v20 }
 0x15c   : > { %v863_v29 = vadd.f32 %v862_v12, %v2259_v20  ;;  %v1144_v27 = vmax.f32 %v939_v0, 0.0 }
 0x15d   : > { %v1157_v14 = vmax.f32 %v822_v9, 0.0  ;;  %v1152_v9 = vmax.f32 %v942_v17, 0.0 }
 0x15e   : > { %v1158_v7 = vmax.f32 %v863_v29, 0.0 }
 0x161   : > { %v944_v38 = vpop.f32.mrf.mxu3 }
 0x162   : > { %v903_v58 = vpop.f32.mrf.mxu2  ;;  %v824_v25 = vpop.f32.mrf.mxu0  ;;  %v945_v62 = vadd.f32 %v944_v38, %v2259_v20 }
 0x163   : > { %v865_v5 = vpop.f32.mrf.mxu1  ;;  %v825_v15 = vadd.f32 %v824_v25, %v2257_v24  ;;  %v904_v35 = vadd.f32 %v903_v58, %v2259_v20  ;;  %v2293_v25 = vpop.permute.xlu1 %726  ;;  %v901_v58 = vadd.f32 %v2253_v55, %v2261_v48 }
 0x164   : > { %v866_v30 = vadd.f32 %v865_v5, %v2257_v24  ;;  %v851_v5 = vadd.f32 %v2237_v42, %v2286_v21  ;;  %v807_v32 = vadd.f32 %v2227_v13, %v2293_v25  ;;  %v848_v42 = vadd.f32 %v2229_v8, %v2293_v25 }
 0x165   : > { %v1165_v49 = vmax.f32 %v825_v15, 0.0  ;;  %v1134_v15 = vmax.f32 %v854_v22, 0.0  ;;  %v898_v13 = vadd.f32 %v2249_v36, %v2265_v59  ;;  %v936_v8 = vadd.f32 %v2243_v6, %v2273_v61 }
 0x166   : > { %v1166_v23 = vmax.f32 %v866_v30, 0.0  ;;  %v1159_v30 = vmax.f32 %v904_v35, 0.0  ;;  %v1117_v29 = vmax.f32 %v807_v32, 0.0  ;;  %v895_v36 = vadd.f32 %v2245_v33, %v2273_v61 }
 0x167   : > { %v933_v6 = vadd.f32 %v2239_v54, %v2286_v21  ;;  %v892_v33 = vadd.f32 %v2241_v57, %v2286_v21  ;;  %v1143_v34 = vmax.f32 %v898_v13, 0.0  ;;  %v889_v54 = vadd.f32 %v2231_v11, %v2293_v25 }
 0x169   : > { %v947_v50 = vpop.f32.mrf.mxu3  ;;  %v1127_v57 = vmax.f32 %v892_v33, 0.0  ;;  %v1119_v11 = vmax.f32 %v889_v54, 0.0 }
 0x16a   : > { %v906_v16 = vpop.f32.mrf.mxu2  ;;  %v827_v47 = vpop.f32.mrf.mxu0  ;;  %v948_v40 = vadd.f32 %v947_v50, %v2257_v24  ;;  %v1142_v50 = vmax.f32 %v857_v41, 0.0  ;;  %v1135_v41 = vmax.f32 %v895_v36, 0.0 }
 0x16b   : > { %v828_v18 = vadd.f32 %v827_v47, %v2255_v19  ;;  %v868_v63 = vpop.f32.mrf.mxu1  ;;  %v907_v43 = vadd.f32 %v906_v16, %v2257_v24  ;;  %v1133_v16 = vmax.f32 %v813_v52, 0.0 }
 0x16c   : > { %v869_v37 = vadd.f32 %v868_v63, %v2255_v19  ;;  %v1168_v38 = vmax.f32 %v948_v40, 0.0  ;;  %v1125_v63 = vmax.f32 %v810_v31, 0.0 }
 0x16d   : > { %v1173_v39 = vmax.f32 %v828_v18, 0.0  ;;  %v1167_v47 = vmax.f32 %v907_v43, 0.0  ;;  %v1160_v18 = vmax.f32 %v945_v62, 0.0 }
 0x16e   : > { %v1174_v45 = vmax.f32 %v869_v37, 0.0  ;;  %v1126_v37 = vmax.f32 %v851_v5, 0.0 }
 0x16f   : > { %1200 = vmatpush.msra.mxu0 %v1173_v39 }
 0x170   : > { %1220 = vmatpush.msra.mxu1 %v1174_v45  ;;  %v1151_v45 = vmax.f32 %v901_v58, 0.0 }
 0x171   : > { %v950_v60 = vpop.f32.mrf.mxu3  ;;  %1201 = vmatpush.msra.mxu0 %v1165_v49  ;;  %v1118_v49 = vmax.f32 %v848_v42, 0.0 }
 0x172   : > { %v909_v56 = vpop.f32.mrf.mxu2  ;;  %v951_v2 = vadd.f32 %v950_v60, %v2255_v19  ;;  %1221 = vmatpush.msra.mxu1 %v1166_v23  ;;  %v2279_v28 = vpop.f32.mrf.mxu0  ;;  %v2326_v23 = vld [vmem:[%s2428_s5] sm:$0x7]  ;;  %v1136_v60 = vmax.f32 %v936_v8, 0.0 }
 0x173   : > { %v910_v44 = vadd.f32 %v909_v56, %v2255_v19  ;;  %v2284_v4 = vpop.f32.mrf.mxu1  ;;  %1202 = vmatpush.msra.mxu0 %v1157_v14  ;;  %v930_v14 = vadd.f32 %v2233_v1, %v2293_v25 }
 0x174   : > { %v1176_v51 = vmax.f32 %v951_v2, 0.0  ;;  %1222 = vmatpush.msra.mxu1 %v1158_v7  ;;  %v1128_v7 = vmax.f32 %v933_v6, 0.0 }
 0x175   : > { %v1175_v12 = vmax.f32 %v910_v44, 0.0  ;;  %1203 = vmatpush.msra.mxu0 %v1149_v53  ;;  %v1120_v1 = vmax.f32 %v930_v14, 0.0 }
 0x176   : > { %1223 = vmatpush.msra.mxu1 %v1150_v3  ;;  %1260 = vmatpush.msra.mxu3 %v1176_v51 }
 0x177   : > { %1240 = vmatpush.msra.mxu2 %v1175_v12  ;;  %1204 = vmatpush.msra.mxu0 %v1141_v10 }
 0x178   : > { %1224 = vmatpush.msra.mxu1 %v1142_v50  ;;  %1261 = vmatpush.msra.mxu3 %v1168_v38 }
 0x179   : > { %1241 = vmatpush.msra.mxu2 %v1167_v47  ;;  %v2309_v55 = vpop.f32.mrf.mxu3  ;;  %1205 = vmatpush.msra.mxu0 %v1133_v16 }
 0x17a   : > { %v2313_v39 = vpop.f32.mrf.mxu2  ;;  %1225 = vmatpush.msra.mxu1 %v1134_v15  ;;  %1262 = vmatpush.msra.mxu3 %v1160_v18  ;;  %v2315_v26 = vpop.f32.mrf.mxu0 }
 0x17b   : > { %1242 = vmatpush.msra.mxu2 %v1159_v30  ;;  %v2319_v46 = vpop.f32.mrf.mxu1  ;;  %1206 = vmatpush.msra.mxu0 %v1125_v63 }
 0x17c   : > { %1226 = vmatpush.msra.mxu1 %v1126_v37  ;;  %1263 = vmatpush.msra.mxu3 %v1152_v9 }
 0x17d   : > { %1243 = vmatpush.msra.mxu2 %v1151_v45  ;;  %1207 = vmatpush.msra.mxu0 %v1117_v29 }
 0x17e   : > { %1227 = vmatpush.msra.mxu1 %v1118_v49  ;;  %1264 = vmatpush.msra.mxu3 %v1144_v27 }
 0x17f   : > { %1244 = vmatpush.msra.mxu2 %v1143_v34  ;;  %1547 = vmatmul.msk.f32.vlgmr.msra.gmra.mxu0 %vm1188_vm1, %v2326_v23 }
 0x180   : > { %1548 = vmatmul.msk.f32.vlgmr.msra.gmra.mxu1 %vm1188_vm1, %v2326_v23  ;;  %1265 = vmatpush.msra.mxu3 %v1136_v60 }
 0x181   : > { %1245 = vmatpush.msra.mxu2 %v1135_v41  ;;  %v2338_v40 = vpop.f32.mrf.mxu3 }
 0x182   : > { %v2340_v56 = vpop.f32.mrf.mxu2  ;;  %1266 = vmatpush.msra.mxu3 %v1128_v7  ;;  %v976_v2 = vpop.f32.mrf.mxu0 }
 0x183   : > { %1246 = vmatpush.msra.mxu2 %v1127_v57  ;;  %v1017_v52 = vpop.f32.mrf.mxu1  ;;  %v977_v41 = vadd.f32 %v976_v2, %v2273_v61 }
 0x184   : > { %1267 = vmatpush.msra.mxu3 %v1120_v1 }
 0x185   : > { %1247 = vmatpush.msra.mxu2 %v1119_v11  ;;  %1550 = vmatmul.msk.f32.vlgmr.msra.gmra.mxu3 %vm1188_vm1, %v2326_v23  ;;  %v1018_v11 = vadd.f32 %v1017_v52, %v2273_v61 }
 0x186   : > { %1549 = vmatmul.msk.f32.vlgmr.msra.gmra.mxu2 %vm1188_vm1, %v2326_v23 }
 0x189   : > { %v2346_v53 = vpop.f32.mrf.mxu3 }
 0x18a   : > { %v2348_v43 = vpop.f32.mrf.mxu2  ;;  %v979_v44 = vpop.f32.mrf.mxu0 }
 0x18b   : > { %v1020_v22 = vpop.f32.mrf.mxu1  ;;  %v980_v49 = vadd.f32 %v979_v44, %v2265_v59 }
 0x18c   : > { %v1021_v33 = vadd.f32 %v1020_v22, %v2265_v59 }
 0x191   : > { %v2350_v3 = vpop.f32.mrf.mxu3 }
 0x192   : > { %v2352_v62 = vpop.f32.mrf.mxu2  ;;  %v982_v51 = vpop.f32.mrf.mxu0 }
 0x193   : > { %v1023_v31 = vpop.f32.mrf.mxu1  ;;  %v983_v9 = vadd.f32 %v982_v51, %v2261_v48 }
 0x194   : > { %v1024_v36 = vadd.f32 %v1023_v31, %v2261_v48  ;;  %v974_v31 = vadd.f32 %v2315_v26, %v2286_v21 }
 0x195   : > { %v1153_v7 = vmax.f32 %v983_v9, 0.0 }
 0x196   : > { %v1154_v44 = vmax.f32 %v1024_v36, 0.0 }
 0x199   : > { %v1105_v10 = vpop.f32.mrf.mxu3 }
 0x19a   : > { %v1064_v35 = vpop.f32.mrf.mxu2  ;;  %v985_v12 = vpop.f32.mrf.mxu0 }
 0x19b   : > { %v1026_v5 = vpop.f32.mrf.mxu1  ;;  %v986_v13 = vadd.f32 %v985_v12, %v2259_v20  ;;  %v1145_v12 = vmax.f32 %v980_v49, 0.0  ;;  %v1065_v26 = vadd.f32 %v1064_v35, %v2261_v48  ;;  %v1100_v35 = vadd.f32 %v2346_v53, %v2273_v61 }
 0x19c   : > { %v1027_v37 = vadd.f32 %v1026_v5, %v2259_v20  ;;  %v1056_v53 = vadd.f32 %v2340_v56, %v2286_v21 }
 0x19d   : > { %v1161_v6 = vmax.f32 %v986_v13, 0.0 }
 0x19e   : > { %v1162_v34 = vmax.f32 %v1027_v37, 0.0 }
 0x1a1   : > { %v1108_v50 = vpop.f32.mrf.mxu3 }
 0x1a2   : > { %v1067_v17 = vpop.f32.mrf.mxu2  ;;  %v988_v38 = vpop.f32.mrf.mxu0  ;;  %v1109_v22 = vadd.f32 %v1108_v50, %v2259_v20  ;;  %v971_v50 = vadd.f32 %v2279_v28, %v2293_v25  ;;  %v1062_v28 = vadd.f32 %v2352_v62, %v2265_v59 }
 0x1a3   : > { %v1029_v32 = vpop.f32.mrf.mxu1  ;;  %v989_v42 = vadd.f32 %v988_v38, %v2257_v24  ;;  %v1068_v5 = vadd.f32 %v1067_v17, %v2259_v20  ;;  %v1106_v38 = vadd.f32 %v1105_v10, %v2261_v48  ;;  %v1012_v20 = vadd.f32 %v2284_v4, %v2293_v25 }
 0x1a4   : > { %v1030_v18 = vadd.f32 %v1029_v32, %v2257_v24  ;;  %v1137_v32 = vmax.f32 %v977_v41, 0.0  ;;  %v1138_v17 = vmax.f32 %v1018_v11, 0.0  ;;  %v1164_v10 = vmax.f32 %v1109_v22, 0.0 }
 0x1a5   : > { %v1169_v29 = vmax.f32 %v989_v42, 0.0  ;;  %v1156_v42 = vmax.f32 %v1106_v38, 0.0  ;;  %v1121_v4 = vmax.f32 %v971_v50, 0.0 }
 0x1a6   : > { %v1170_v45 = vmax.f32 %v1030_v18, 0.0  ;;  %v1147_v18 = vmax.f32 %v1062_v28, 0.0 }
 0x1a9   : > { %v1111_v16 = vpop.f32.mrf.mxu3 }
 0x1aa   : > { %v1070_v58 = vpop.f32.mrf.mxu2  ;;  %v991_v47 = vpop.f32.mrf.mxu0  ;;  %v1112_v14 = vadd.f32 %v1111_v16, %v2257_v24 }
 0x1ab   : > { %v992_v15 = vadd.f32 %v991_v47, %v2255_v19  ;;  %v1032_v0 = vpop.f32.mrf.mxu1  ;;  %v1071_v57 = vadd.f32 %v1070_v58, %v2257_v24  ;;  %v1015_v24 = vadd.f32 %v2319_v46, %v2286_v21  ;;  %v1103_v46 = vadd.f32 %v2350_v3, %v2265_v59 }
 0x1ac   : > { %v1033_v63 = vadd.f32 %v1032_v0, %v2255_v19  ;;  %v1172_v52 = vmax.f32 %v1112_v14, 0.0  ;;  %v1129_v58 = vmax.f32 %v974_v31, 0.0  ;;  %v1163_v47 = vmax.f32 %v1068_v5, 0.0 }
 0x1ad   : > { %v1177_v30 = vmax.f32 %v992_v15, 0.0  ;;  %v1171_v16 = vmax.f32 %v1071_v57, 0.0  ;;  %v1130_v48 = vmax.f32 %v1015_v24, 0.0  ;;  %v1059_v3 = vadd.f32 %v2348_v43, %v2273_v61 }
 0x1ae   : > { %v1178_v8 = vmax.f32 %v1033_v63, 0.0  ;;  %v1155_v15 = vmax.f32 %v1065_v26, 0.0  ;;  %v1122_v0 = vmax.f32 %v1012_v20, 0.0  ;;  %v1097_v59 = vadd.f32 %v2338_v40, %v2286_v21 }
 0x1af   : > { %1280 = vmatpush.msrb.mxu0 %v1177_v30  ;;  %v1148_v62 = vmax.f32 %v1103_v46, 0.0  ;;  %v1094_v63 = vadd.f32 %v2309_v55, %v2293_v25  ;;  %v1140_v61 = vmax.f32 %v1100_v35, 0.0  ;;  %v1053_v43 = vadd.f32 %v2313_v39, %v2293_v25  ;;  %v1186_v25 = vpop.permute.xlu2 %1185 }
 0x1b0   : > { %1300 = vmatpush.msrb.mxu1 %v1178_v8  ;;  %v1139_v13 = vmax.f32 %v1059_v3, 0.0  ;;  %v1132_v40 = vmax.f32 %v1097_v59, 0.0  ;;  %v1131_v21 = vmax.f32 %v1056_v53, 0.0 }
 0x1b1   : > { %v1114_v27 = vpop.f32.mrf.mxu3  ;;  %1281 = vmatpush.msrb.mxu0 %v1169_v29  ;;  %v1124_v55 = vmax.f32 %v1094_v63, 0.0  ;;  %v1123_v56 = vmax.f32 %v1053_v43, 0.0 }
 0x1b2   : > { %v1073_v60 = vpop.f32.mrf.mxu2  ;;  %v1115_v54 = vadd.f32 %v1114_v27, %v2255_v19  ;;  %1301 = vmatpush.msrb.mxu1 %v1170_v45 }
 0x1b3   : > { %v1074_v1 = vadd.f32 %v1073_v60, %v2255_v19  ;;  %1282 = vmatpush.msrb.mxu0 %v1161_v6  ;;  %v1146_v19 = vmax.f32 %v1021_v33, 0.0 }
 0x1b4   : > { %v1180_v51 = vmax.f32 %v1115_v54, 0.0  ;;  %1302 = vmatpush.msrb.mxu1 %v1162_v34 }
 0x1b5   : > { %v1179_v2 = vmax.f32 %v1074_v1, 0.0  ;;  %1283 = vmatpush.msrb.mxu0 %v1153_v7 }
 0x1b6   : > { %1303 = vmatpush.msrb.mxu1 %v1154_v44  ;;  %1340 = vmatpush.msrb.mxu3 %v1180_v51 }
 0x1b7   : > { %1320 = vmatpush.msrb.mxu2 %v1179_v2  ;;  %1284 = vmatpush.msrb.mxu0 %v1145_v12 }
 0x1b8   : > { %1304 = vmatpush.msrb.mxu1 %v1146_v19  ;;  %1341 = vmatpush.msrb.mxu3 %v1172_v52 }
 0x1b9   : > { %1321 = vmatpush.msrb.mxu2 %v1171_v16  ;;  %1285 = vmatpush.msrb.mxu0 %v1137_v32 }
 0x1ba   : > { %1305 = vmatpush.msrb.mxu1 %v1138_v17  ;;  %1342 = vmatpush.msrb.mxu3 %v1164_v10 }
 0x1bb   : > { %1322 = vmatpush.msrb.mxu2 %v1163_v47  ;;  %1286 = vmatpush.msrb.mxu0 %v1129_v58 }
 0x1bc   : > { %1306 = vmatpush.msrb.mxu1 %v1130_v48  ;;  %1343 = vmatpush.msrb.mxu3 %v1156_v42 }
 0x1bd   : > { %1323 = vmatpush.msrb.mxu2 %v1155_v15  ;;  %1287 = vmatpush.msrb.mxu0 %v1121_v4 }
 0x1be   : > { %1307 = vmatpush.msrb.mxu1 %v1122_v0  ;;  %1344 = vmatpush.msrb.mxu3 %v1148_v62 }
 0x1bf   : > { %1324 = vmatpush.msrb.mxu2 %v1147_v18  ;;  %1551 = vmatmul.msk.f32.vlgmr.msrb.gmra.mxu0 %vm1188_vm1, %v2326_v23 }
 0x1c0   : > { %1552 = vmatmul.msk.f32.vlgmr.msrb.gmra.mxu1 %vm1188_vm1, %v2326_v23  ;;  %1345 = vmatpush.msrb.mxu3 %v1140_v61 }
 0x1c1   : > { %1325 = vmatpush.msrb.mxu2 %v1139_v13 }
 0x1c2   : > { %1346 = vmatpush.msrb.mxu3 %v1132_v40 }
 0x1c3   : > { %1326 = vmatpush.msrb.mxu2 %v1131_v21 }
 0x1c4   : > { %1347 = vmatpush.msrb.mxu3 %v1124_v55 }
 0x1c5   : > { %1327 = vmatpush.msrb.mxu2 %v1123_v56  ;;  %1554 = vmatmul.msk.f32.vlgmr.msrb.gmra.mxu3 %vm1188_vm1, %v2326_v23 }
 0x1c6   : > { %1553 = vmatmul.msk.f32.vlgmr.msrb.gmra.mxu2 %vm1188_vm1, %v2326_v23 }
 0x1fc   : > { %v1209_v39 = vpop.f32.mrf.mxu0 }
 0x1fd   : > { %v1229_v30 = vpop.f32.mrf.mxu1  ;;  %v1210_v8 = vadd.f32 %v1209_v39, %v1186_v25 }
 0x1fe   : > { %v1230_v37 = vadd.f32 %v1229_v30, %v1186_v25 }
 0x200   : > { %v1360_v9 = vrot.slane %v1230_v37, 4 }
 0x202   : > { %v1365_v29 = vsel %vm1364_vm2, %v1210_v8, %v1360_v9 }
 0x203   : > { %1373 = vst [vmem:[%s322_s18] sm:$0x77] %v1365_v29 }
 0x208   : > { %v1269_v36 = vpop.f32.mrf.mxu3 }
 0x209   : > { %v1249_v45 = vpop.f32.mrf.mxu2  ;;  %v1270_v49 = vadd.f32 %v1269_v36, %v1186_v25 }
 0x20a   : > { %v1250_v6 = vadd.f32 %v1249_v45, %v1186_v25 }
 0x20b   : > { %v1361_v23 = vrot.slane %v1270_v49, 4 }
 0x20d   : > { %v1366_v27 = vsel %vm1364_vm2, %v1250_v6, %v1361_v23 }
 0x20e   : > { %1374 = vst [vmem:[%s322_s18 + $0x8] sm:$0x77] %v1366_v27 }
 0x23c   : > { %v1289_v33 = vpop.f32.mrf.mxu0 }
 0x23d   : > { %v1309_v34 = vpop.f32.mrf.mxu1  ;;  %v1290_v60 = vadd.f32 %v1289_v33, %v1186_v25 }
 0x23e   : > { %v1310_v14 = vadd.f32 %v1309_v34, %v1186_v25 }
 0x240   : > { %v1362_v54 = vrot.slane %v1310_v14, 4 }
 0x242   : > { %v1367_v41 = vsel %vm1364_vm2, %v1290_v60, %v1362_v54 }
 0x243   : > { %1375 = vst [vmem:[%s322_s18 + $0x10] sm:$0x77] %v1367_v41 }
 0x248   : > { %v1349_v7 = vpop.f32.mrf.mxu3 }
 0x249   : > { %v1329_v57 = vpop.f32.mrf.mxu2  ;;  %v1350_v1 = vadd.f32 %v1349_v7, %v1186_v25 }
 0x24a   : > { %v1330_v11 = vadd.f32 %v1329_v57, %v1186_v25 }
 0x24b   : > { %v1363_v44 = vrot.slane %v1350_v1, 4 }
 0x24d   : > { %v1368_v22 = vsel %vm1364_vm2, %v1330_v11, %v1363_v44 }
 0x24e   : > { %1376 = vst [vmem:[%s322_s18 + $0x18] sm:$0x77] %v1368_v22 }
 0x24f PF: > { %s17_s26 = sadd.s32 1, %s1617_s26   ;;  %s2505_s24 = smov %s1613_s25 }
 0x250   : > { %p14_p5 = scmp.ge.s32.totalorder %s17_s26, 4   ;;  %s2506_s25 = smov %s2508_s27 }
 0x252   :  { %16 = sbr.rel (!%p14_p5) target bundleno = 2 (0x2), region = 81 }

</bundles_post_ra>
